<compile_context>
chip_gen: v6e
topology: v6e:2x2x1
jax: 0.10.0
libtpu: 0.0.40
codegen_flags: <defaults>
</compile_context>

<pallas_src>
from functools import partial
from math import sqrt

import jax
import jax.numpy as jnp
from jax.experimental import pallas as pl
from jax.experimental.pallas import tpu as pltpu


# ---------------------------------------------------------------------------
# Kernels
# ---------------------------------------------------------------------------

def _tiled_kernel(xw_ref, xc_ref, o_ref, *, exp_dtype):
    """One (row-tile, col-tile) block of s = exp(xw @ x^T), diag zeroed on i==j.

    xw_ref: (1, TR, C)  row tile of x @ (w/dc)   (precomputed outside the kernel)
    xc_ref: (1, TC, C)  col tile of x
    o_ref : (1, TR, TC) output tile
    """
    i = pl.program_id(1)          # row-tile index
    j = pl.program_id(2)          # col-tile index

    # NT contraction (xw @ xc^T): keeps the transpose off the XLU; f32 accumulation.
    s = jax.lax.dot_general(
        xw_ref[0], xc_ref[0],
        dimension_numbers=(((1,), (1,)), ((), ())),
        preferred_element_type=jnp.float32)
    # exp runs in bf16 only when the output is bf16 (EUP throughput lever on v6e/v7x).
    s = jnp.exp(s.astype(exp_dtype))

    @pl.when(i != j)
    def _():
        o_ref[0] = s.astype(o_ref.dtype)

    @pl.when(i == j)
    def _():
        # TR == TC, so the global diagonal is the local diagonal of this tile.
        # 2-D iota mask (not 3-D) -> single extra VPU pass.
        row = jax.lax.broadcasted_iota(jnp.int32, s.shape, 0)
        col = jax.lax.broadcasted_iota(jnp.int32, s.shape, 1)
        o_ref[0] = jnp.where(row == col, 0.0, s).astype(o_ref.dtype)


def _small_kernel(xw_ref, xc_ref, o_ref, *, n, flat_out, exp_dtype):
    """Small-N path: BT batch elements fused per grid step.

    xw_ref: (BT, N, C)   xc_ref: (BT, N, C)
    o_ref : (BT, N*N) when flat_out (lane-dense stores), else (BT, N, N)
    """
    s = jnp.einsum("bnc,bmc->bnm", xw_ref[...], xc_ref[...],
                   preferred_element_type=jnp.float32)
    s = jnp.exp(s.astype(exp_dtype))

    row = jax.lax.broadcasted_iota(jnp.int32, (n, n), 0)
    col = jax.lax.broadcasted_iota(jnp.int32, (n, n), 1)
    s = jnp.where((row == col)[None, :, :], 0.0, s)

    if flat_out:
        o_ref[...] = s.reshape(s.shape[0], n * n).astype(o_ref.dtype)
    else:
        o_ref[...] = s.astype(o_ref.dtype)


# ---------------------------------------------------------------------------
# Tiling / VMEM helpers
# ---------------------------------------------------------------------------

def _vmem_cap():
    # v5e/v6e: 128 MiB physical VMEM -> cap 64 MiB; v7x: 64 MiB -> cap 32 MiB.
    try:
        phys = pltpu.get_tpu_info().vmem_capacity_bytes
    except Exception:
        phys = 64 * 1024 * 1024          # conservative fallback (v7x per-TC)
    return phys // 2


def _vmem_limit(need_bytes):
    return int(min(max(4 * need_bytes, 16 * 1024 * 1024), _vmem_cap()))


def _pick_tile(n_pad, c, out_itemsize):
    """Largest lane-aligned square tile dividing n_pad that fits a VMEM budget."""
    budget = 24 * 1024 * 1024
    for t in (1024, 512, 256, 128):
        if n_pad % t:
            continue
        need = 2 * 2 * t * c * 4 + 2 * t * t * out_itemsize   # dbl-buffered in/out
        if need <= budget:
            return t
    return 128


def _pick_bt_flat(b, per_batch_out_bytes):
    """Batch tile for the lane-dense flattened (B, N*N) output, or None.

    The flattened block is (BT, N*N); N*N is the full last dim, so legality only
    needs BT == B (full extent) or BT a multiple of 8.
    """
    budget = 2 * 1024 * 1024
    if b * per_batch_out_bytes <= budget:
        return b
    best = None
    for bt in range(8, b, 8):
        if b % bt == 0 and bt * per_batch_out_bytes <= budget:
            best = bt
    return best


def _pick_bt_unflat(b, per_batch_out_bytes):
    budget = 2 * 1024 * 1024
    cap = max(1, budget // max(per_batch_out_bytes, 1))
    for bt in range(min(b, cap), 0, -1):
        if b % bt == 0:
            return bt
    return 1


# ---------------------------------------------------------------------------
# Wrapper
# ---------------------------------------------------------------------------

def _lt_layer_tiled(xw, xc, B, N, C, in_it, out_dtype, out_it, exp_dtype):
    # Pad N up to a multiple of 128: lane-aligned, unmasked stores for any N, and
    # no full-extent output tile that could exceed v7x's 64 MiB VMEM.
    n_pad = ((N + 127) // 128) * 128
    if n_pad != N:
        pad = ((0, 0), (0, n_pad - N), (0, 0))
        xw = jnp.pad(xw, pad)
        xc = jnp.pad(xc, pad)

    tr = tc = _pick_tile(n_pad, C, out_it)
    grid = (B, n_pad // tr, n_pad // tc)

    # Double-buffered row/col input tiles + output tile (headroom added in _vmem_limit).
    need = 2 * (tr * C + tc * C) * in_it + 2 * tr * tc * out_it

    cost = pl.CostEstimate(
        flops=int(2 * B * n_pad * n_pad * C),
        transcendentals=int(B * n_pad * n_pad),
        bytes_accessed=int(
            B * n_pad * C * in_it                        # xw row blocks (constant over j)
            + B * n_pad * C * in_it * (n_pad // tr)      # x col tiles re-read per row tile
            + B * n_pad * n_pad * out_it),               # output at its actual dtype
    )

    out = pl.pallas_call(
        partial(_tiled_kernel, exp_dtype=exp_dtype),
        out_shape=jax.ShapeDtypeStruct((B, n_pad, n_pad), out_dtype),
        grid_spec=pltpu.PrefetchScalarGridSpec(
            num_scalar_prefetch=0,
            grid=grid,
            in_specs=[
                pl.BlockSpec((1, tr, C), lambda b, i, j: (b, i, 0)),   # xw row tile
                pl.BlockSpec((1, tc, C), lambda b, i, j: (b, j, 0)),   # x  col tile
            ],
            out_specs=pl.BlockSpec((1, tr, tc), lambda b, i, j: (b, i, j)),
        ),
        compiler_params=pltpu.CompilerParams(
            dimension_semantics=("parallel", "parallel", "parallel"),
            vmem_limit_bytes=_vmem_limit(need),
        ),
        cost_estimate=cost,
    )(xw, xc)

    if n_pad != N:
        out = out[:, :N, :N]
    return out


def _lt_layer_small(xw, xc, B, N, C, in_it, out_dtype, out_it, exp_dtype):
    nn = N * N
    bt_flat = _pick_bt_flat(B, nn * out_it)
    flat_out = bt_flat is not None
    bt = bt_flat if flat_out else _pick_bt_unflat(B, nn * out_it)

    need = 2 * 2 * bt * N * C * in_it + 2 * bt * nn * out_it
    cost = pl.CostEstimate(
        flops=int(2 * B * nn * C),
        transcendentals=int(B * nn),
        bytes_accessed=int(2 * B * N * C * in_it + B * nn * out_it),
    )

    if flat_out:
        out_shape = jax.ShapeDtypeStruct((B, nn), out_dtype)
        out_spec = pl.BlockSpec((bt, nn), lambda b: (b, 0))
    else:
        out_shape = jax.ShapeDtypeStruct((B, N, N), out_dtype)
        out_spec = pl.BlockSpec((bt, N, N), lambda b: (b, 0, 0))

    out = pl.pallas_call(
        partial(_small_kernel, n=N, flat_out=flat_out, exp_dtype=exp_dtype),
        out_shape=out_shape,
        grid_spec=pltpu.PrefetchScalarGridSpec(
            num_scalar_prefetch=0,
            grid=(B // bt,),
            in_specs=[
                pl.BlockSpec((bt, N, C), lambda b: (b, 0, 0)),
                pl.BlockSpec((bt, N, C), lambda b: (b, 0, 0)),
            ],
            out_specs=out_spec,
        ),
        compiler_params=pltpu.CompilerParams(
            dimension_semantics=("parallel",),
            vmem_limit_bytes=_vmem_limit(need),
        ),
        cost_estimate=cost,
    )(xw, xc)

    if flat_out:
        out = out.reshape(B, N, N)
    return out


def lt_layer(x, w, dc, *, out_dtype=None):
    """Pallas forward of LTLayer: exp(x @ w @ x^T / dc), ReLU (no-op), zero diagonal.

    out_dtype=jnp.bfloat16 is an opt-in knob that halves HBM writeback and runs the
    exp in bf16; the default preserves the module's float32 output.
    """
    # TODO(synk): the optional `mask` argument of the PyTorch forward is not
    # implemented (its (B, N) -> (B, N, N) broadcast is only well-defined for
    # degenerate shapes); only the mask=None path is reproduced.
    B, N, C = x.shape
    out_dtype = jnp.dtype(x.dtype if out_dtype is None else out_dtype)
    exp_dtype = jnp.bfloat16 if out_dtype == jnp.dtype(jnp.bfloat16) else jnp.float32
    in_it = jnp.dtype(x.dtype).itemsize
    out_it = out_dtype.itemsize

    # Fold 1/dc into w and hoist the first (badly shaped, K=N=C) matmul out of the
    # kernel: one XLA matmul instead of N/TC in-kernel recomputations per row tile.
    w_scaled = (w.astype(jnp.float32) * (1.0 / float(dc))).astype(x.dtype)
    xw = jnp.einsum("bnc,cd->bnd", x, w_scaled,
                    preferred_element_type=jnp.float32).astype(x.dtype)

    # TODO(synk): on v7x, additionally casting the dot operands to bf16 (with f32
    # accumulation) would cut MXU passes ~3x; left out to keep f32 score numerics.

    if N >= 128:
        return _lt_layer_tiled(xw, x, B, N, C, in_it, out_dtype, out_it, exp_dtype)
    return _lt_layer_small(xw, x, B, N, C, in_it, out_dtype, out_it, exp_dtype)


# ---------------------------------------------------------------------------
# Reference + init
# ---------------------------------------------------------------------------

def init_w(key, in_channels):
    # Mirrors reset_parameters(): uniform(-stdv, stdv) + identity
    stdv = 1.0 / sqrt(in_channels)
    w = jax.random.uniform(key, (in_channels, in_channels), dtype=jnp.float32,
                           minval=-stdv, maxval=stdv)
    return w + jnp.eye(in_channels, dtype=jnp.float32)


def lt_layer_ref(x, w, dc):
    # Same math as the PyTorch forward: exp(x @ w @ x^T / dc), ReLU, zero diagonal.
    t = jnp.einsum("bnc,cd->bnd", x, w, preferred_element_type=jnp.float32)
    s = jnp.einsum("bnc,bmc->bnm", t, x, preferred_element_type=jnp.float32)
    s = jnp.maximum(jnp.exp(s / dc), 0.0)
    n = x.shape[-2]
    return s * (1.0 - jnp.eye(n, dtype=s.dtype))


if __name__ == "__main__":
    # Case 1: tiny shapes (small-N fused-batch, lane-dense flattened output),
    # matching the module's typical test size.
    B, N, C, dc = 2, 16, 8, 4.0
    kx, kw = jax.random.split(jax.random.PRNGKey(0))
    x = jax.random.normal(kx, (B, N, C), dtype=jnp.float32)
    w = init_w(kw, C)
    out = jax.block_until_ready(lt_layer(x, w, dc))
    ref = lt_layer_ref(x, w, dc)
    assert out.shape == (B, N, N)
    assert jnp.allclose(out, ref, atol=1e-4, rtol=1e-4)

    # Case 2: tiled path with off-diagonal tiles (N multiple of 128), f32 output.
    B2, N2, C2, dc2 = 2, 384, 32, 8.0
    kx2, kw2 = jax.random.split(jax.random.PRNGKey(1))
    x2 = 0.5 * jax.random.normal(kx2, (B2, N2, C2), dtype=jnp.float32)
    w2 = init_w(kw2, C2)
    out2 = jax.block_until_ready(lt_layer(x2, w2, dc2))
    ref2 = lt_layer_ref(x2, w2, dc2)
    assert out2.shape == (B2, N2, N2)
    assert jnp.allclose(out2, ref2, atol=5e-3, rtol=5e-3)

    # Case 3: bf16-output knob (halved writeback; exp in bf16) on the same shapes.
    out3 = jax.block_until_ready(lt_layer(x2, w2, dc2, out_dtype=jnp.bfloat16))
    assert out3.dtype == jnp.bfloat16
    assert jnp.allclose(out3.astype(jnp.float32), ref2, atol=2e-2, rtol=2e-2)

    # Case 4: N not a multiple of 128 exercises the pad-to-128 path (no full-extent
    # tile fallback anymore).
    B4, N4, C4, dc4 = 2, 200, 16, 8.0
    kx4, kw4 = jax.random.split(jax.random.PRNGKey(2))
    x4 = 0.5 * jax.random.normal(kx4, (B4, N4, C4), dtype=jnp.float32)
    w4 = init_w(kw4, C4)
    out4 = jax.block_until_ready(lt_layer(x4, w4, dc4))
    ref4 = lt_layer_ref(x4, w4, dc4)
    assert out4.shape == (B4, N4, N4)
    assert jnp.allclose(out4, ref4, atol=5e-3, rtol=5e-3)

    print("KERNEL_OK")
</pallas_src>

<mosaic_0001>
module attributes {stable_mosaic.version = 11 : i64} {
  func.func @_small_kernel(%arg0: i32, %arg1: memref<2x16x8xf32, #tpu.memory_space<vmem>>, %arg2: memref<2x16x8xf32, #tpu.memory_space<vmem>>, %arg3: memref<2x256xf32, #tpu.memory_space<vmem>>) attributes {dimension_semantics = [#tpu.dimension_semantics<parallel>], iteration_bounds = array<i64: 1>, scalar_prefetch = 0 : i64, scratch_operands = 0 : i64, tpu.core_type = #tpu.core_type<tc>, window_params = [{transform_indices = @transform_0, window_bounds = array<i64: 2, 16, 8>}, {transform_indices = @transform_1, window_bounds = array<i64: 2, 16, 8>}, {transform_indices = @transform_2, window_bounds = array<i64: 2, 256>}]} {
    %c0 = arith.constant 0 : index
    %c0_0 = arith.constant 0 : index
    %c0_1 = arith.constant 0 : index
    %0 = vector.load %arg1[%c0, %c0_0, %c0_1] : memref<2x16x8xf32, #tpu.memory_space<vmem>>, vector<2x16x8xf32>
    %c0_2 = arith.constant 0 : index
    %c0_3 = arith.constant 0 : index
    %c0_4 = arith.constant 0 : index
    %1 = vector.load %arg2[%c0_2, %c0_3, %c0_4] : memref<2x16x8xf32, #tpu.memory_space<vmem>>, vector<2x16x8xf32>
    "tpu.trace_start"() <{level = 10 : i32, message = "bnc,bmc->bnm"}> : () -> ()
    %cst = arith.constant dense<0.000000e+00> : vector<2x16x16xf32>
    %2 = tpu.matmul %0, %1, %cst {dimension_numbers = #tpu.dot_dimension_numbers<[2], [2], [1], [1], [0, 0, 0, 1, 1, 1], [0], [0]>} : vector<2x16x8xf32>, vector<2x16x8xf32>, vector<2x16x16xf32> -> vector<2x16x16xf32>
    "tpu.trace_stop"() : () -> ()
    %3 = math.exp %2 : vector<2x16x16xf32>
    %4 = tpu.iota {dimensions = array<i32: 0>} : vector<16x16xi32>
    %5 = tpu.iota {dimensions = array<i32: 1>} : vector<16x16xi32>
    %6 = arith.cmpi eq, %4, %5 : vector<16x16xi32>
    %7 = vector.shape_cast %6 : vector<16x16xi1> to vector<1x16x16xi1>
    %cst_5 = arith.constant 0.000000e+00 : f32
    %8 = vector.shape_cast %7 : vector<1x16x16xi1> to vector<1x16x16xi1>
    %9 = vector.broadcast %8 : vector<1x16x16xi1> to vector<2x16x16xi1>
    %10 = vector.broadcast %cst_5 : f32 to vector<2x16x16xf32>
    %11 = arith.select %9, %10, %3 : vector<2x16x16xi1>, vector<2x16x16xf32>
    %12 = vector.shape_cast %11 : vector<2x16x16xf32> to vector<2x256xf32>
    %c0_6 = arith.constant 0 : index
    %c0_7 = arith.constant 0 : index
    %13 = vector.load %arg3[%c0_6, %c0_7] : memref<2x256xf32, #tpu.memory_space<vmem>>, vector<2x256xf32>
    tpu.vector_store %arg3[%c0_6, %c0_7], %12 {strides = array<i32>} : memref<2x256xf32, #tpu.memory_space<vmem>>, vector<2x256xf32>,
    return
  }
  func.func @transform_0(%arg0: i32) -> (i32, i32, i32) {
    %c0_i32 = arith.constant 0 : i32
    %c0_i32_0 = arith.constant 0 : i32
    %c0_i32_1 = arith.constant 0 : i32
    return %arg0, %c0_i32, %c0_i32_0 : i32, i32, i32
  }
  func.func @transform_1(%arg0: i32) -> (i32, i32, i32) {
    %c0_i32 = arith.constant 0 : i32
    %c0_i32_0 = arith.constant 0 : i32
    %c0_i32_1 = arith.constant 0 : i32
    return %arg0, %c0_i32, %c0_i32_0 : i32, i32, i32
  }
  func.func @transform_2(%arg0: i32) -> (i32, i32) {
    %c0_i32 = arith.constant 0 : i32
    %c0_i32_0 = arith.constant 0 : i32
    return %arg0, %c0_i32 : i32, i32
  }
}

</mosaic_0001>

<bundles_post_ra>
// kernel: tpu_custom_call.1
= control target key start
LH: loop header
LB: loop body
LE: loop exit
PB: predicated region body
PF: predicated region fallthrough
CT: control target
= control target key end

     0   :  { %vm20_vm0 = vcmask 64512   ;;  %s590_s0 = inlined_call_operand.vmem [shape: f32[2,16,8], index: 0, kind: input, shape index: {}]   ;;  %s591_s1 = inlined_call_operand.vmem [shape: f32[2,16,8], index: 1, kind: input, shape index: {}]   ;;  %s592_s2 = inlined_call_operand.hbm [shape: f32[2,256], index: 2, kind: output, shape index: {}]  }
   0x1   :  { %v17_v0 = vld [vmem:[%s591_s1 + $0x8] sm:$0xff]  ;;  %v19_v1 = vld [vmem:[%s591_s1 + $0x18] sm:$0xff]  ;;  %v16_v2 = vld [vmem:[%s591_s1] sm:$0xff] }
   0x2   :  { %470 = vmatprep.subr.msk.mxu0 %vm20_vm0, %v17_v0  ;;  %477 = vmatprep.subr.msk.mxu1 %vm20_vm0, %v19_v1  ;;  %v18_v3 = vld [vmem:[%s591_s1 + $0x10] sm:$0xff]  ;;  %v12_v4 = vld [vmem:[%s590_s0] sm:$0xff] }
   0x3   :  { %v14_v5 = vld [vmem:[%s590_s0 + $0x10] sm:$0xff]  ;;  %471 = vmatpush3.xpose.msk.msra.mxu0 %vm20_vm0, %v17_v0  ;;  %478 = vmatpush3.xpose.msk.msra.mxu1 %vm20_vm0, %v19_v1 }
   0x4   :  { %7 = vsyncpa [#allocation3], 0  ;;  %472 = vmatprep.subr.msk.mxu0 %vm20_vm0, %v16_v2  ;;  %479 = vmatprep.subr.msk.mxu1 %vm20_vm0, %v18_v3  ;;  %v13_v6 = vld [vmem:[%s590_s0 + $0x8] sm:$0xff]  ;;  %v15_v7 = vld [vmem:[%s590_s0 + $0x18] sm:$0xff]  ;;  %v203_v14 = vlaneseq  ;;  %v525_v18 = vmov 1983009808  }
   0x5   :  { %474 = vmatprep.mubr.msk.f32.mxu0 %vm20_vm0, %v12_v4  ;;  %481 = vmatprep.mubr.msk.f32.mxu1 %vm20_vm0, %v14_v5  ;;  %v220_v19 = vunpack.c.l.s4 %v525_v18  ;;  %v526_v23 = vmov 1934713408   ;;  %v527_v42 = vmov 0.0   ;;  %s528_s0 = smov 32   ;;  %s529_s24 = smov 16   ;;  %vm406_vm3 = vcmask 130048  }
   0x6   :  { %v204_v17 = vshrl.u32 %v203_v14, 7  ;;  %v207_v21 = vand.u32 127, %v203_v14  ;;  %v251_v24 = vunpack.c.l.s4 %v526_v23  ;;  %s530_s25 = smov 48   ;;  %s531_s26 = smov 64   ;;  %vm408_vm4 = vcmask 261120  }
   0x7   :  { %473 = vmatpush3.xpose.msk.msra.mxu0 %vm20_vm0, %v16_v2  ;;  %480 = vmatpush3.xpose.msk.msra.mxu1 %vm20_vm0, %v18_v3  ;;  %v221_v22 = vunpack.c.0.s8 %v220_v19  ;;  %s532_s27 = smov 96   ;;  %s533_s28 = smov 80   ;;  %vm410_vm5 = vcmask 392192   ;;  %vm412_vm6 = vcmask 523264   ;;  %vm414_vm7 = vcmask 654336  }
   0x8   :  { %v205_v20 = vadd.s32 8, %v204_v17  ;;  %v252_v26 = vunpack.c.0.s8 %v251_v24  ;;  %vm208_vm2 = vcmp.eq.s32.totalorder %v204_v17, %v207_v21  ;;  %s534_s29 = smov 112   ;;  %vm416_vm8 = vcmask 785408   ;;  %s535_s30 = smov [#allocation2]  }
   0x9   :  { %v224_v25 = vsub.s32 %v221_v22, %v204_v17  ;;  %vm418_vm9 = vcmask 916480   ;;  %s445_s3 = sshll.u32 %s535_s30, 4  ;;  %s446_s3 = int_to_ptr.vmem [resolvable:$true] %s445_s3 }
   0xa   :  { %475 = vmatmul.mubr.msk.f32.vlgmr.msra.gmra.mxu0 %vm20_vm0, %v13_v6  ;;  %482 = vmatmul.mubr.msk.f32.vlgmr.msra.gmra.mxu1 %vm20_vm0, %v15_v7  ;;  %vm209_vm1 = vcmp.eq.s32.totalorder %v205_v20, %v207_v21  ;;  %v255_v34 = vsub.s32 %v252_v26, %v204_v17  ;;  %s503_s4 = scalar_lea.vmem %s446_s3, 64  ;;  %p508_p1 = scmp.lt.s32.totalorder %s446_s3, %s446_s3 }
   0xb   :  { %p504_p0 = scmp.ne.s32.totalorder %s446_s3, %s503_s4  ;;  %p509_p2 = scmp.lt.s32.totalorder %s503_s4, %s503_s4 }
   0xd   :  { %p510_p3 = por %p509_p2, %p508_p1 }
   0xf   :  { %p511_p4 = pnand %p510_p3, %p504_p0 }
  0xca   :  { %v476_v8 = vpop.f32.mrf.mxu0  ;;  %v483_v9 = vpop.f32.mrf.mxu1 }
  0xcb   :  { %v197_v10 = vmul.f32 1.442695, %v476_v8  ;;  %v201_v11 = vmul.f32 1.442695, %v483_v9 }
  0xcc   :  { %v99_v12 = vpop.f32.mrf.mxu0  ;;  %v186_v13 = vpop.f32.mrf.mxu1 }
  0xcd   :  { %495 = vpow2.f32 %v197_v10  ;;  %v195_v15 = vmul.f32 1.442695, %v99_v12  ;;  %v199_v16 = vmul.f32 1.442695, %v186_v13 }
  0xce   :  { %497 = vpow2.f32 %v201_v11 }
  0xcf   :  { %499 = vpow2.f32 %v195_v15 }
  0xd0   :  { %501 = vpow2.f32 %v199_v16 }
  0xda   :  { %v496_v27 = vpop.eup %495 }
  0xdb   :  { %v498_v28 = vpop.eup %497  ;;  %v215_v29 = vsel %vm209_vm1, 0.0, %v496_v27 }
  0xdc   :  { %v500_v30 = vpop.eup %499  ;;  %v217_v31 = vsel %vm209_vm1, 0.0, %v498_v28  ;;  %v291_v32 = vrot.slane %v215_v29, %v224_v25  ;;  %v284_v44 = vcombine.high %v215_v29, %v527_v42 }
  0xdd   :  { %v502_v33 = vpop.eup %501  ;;  %v306_v35 = vrot.slane %v217_v31, %v224_v25  ;;  %v214_v36 = vsel %vm208_vm2, 0.0, %v500_v30  ;;  %v299_v43 = vcombine.high %v217_v31, %v527_v42 }
  0xde   :  { %v216_v37 = vsel %vm208_vm2, 0.0, %v502_v33  ;;  %v225_v38 = vrot.slane %v214_v36, %v224_v25  ;;  %v218_v51 = vcombine.high %v214_v36, %v527_v42  ;;  %v298_v54 = vrot.slane %v284_v44, %v224_v25 }
  0xdf   :  { %v315_v39 = vcombine.high %v291_v32, %v306_v35  ;;  %v314_v40 = vcombine.low %v291_v32, %v306_v35  ;;  %v240_v41 = vrot.slane %v216_v37, %v224_v25  ;;  %v233_v52 = vcombine.high %v216_v37, %v527_v42 }
  0xe0   :  { %v313_v55 = vrot.slane %v299_v43, %v224_v25  ;;  %v232_v57 = vrot.slane %v218_v51, %v224_v25 }
  0xe1   :  { %v329_v45 = vrot.slane %v315_v39, %v255_v34  ;;  %v322_v46 = vrot.slane %v314_v40, %v255_v34  ;;  %v249_v47 = vcombine.high %v225_v38, %v240_v41  ;;  %v248_v48 = vcombine.low %v225_v38, %v240_v41 }
  0xe2   :  { %v247_v58 = vrot.slane %v233_v52, %v224_v25  ;;  %v330_v60 = vcombine.low %v298_v54, %v313_v55  ;;  %v331_v0 = vcombine.high %v298_v54, %v313_v55 }
  0xe3   :  { %383 = vrot.lane.b32.xlu1 %v329_v45, %s528_s0  ;;  %v346_v49 = vcombine.high %v322_v46, %v527_v42  ;;  %v256_v50 = vrot.slane %v248_v48, %v255_v34  ;;  %v263_v53 = vrot.slane %v249_v47, %v255_v34  ;;  %v347_v59 = vcombine.high %v329_v45, %v527_v42 }
  0xe4   :  { %v264_v62 = vcombine.low %v232_v57, %v247_v58  ;;  %v338_v63 = vrot.slane %v330_v60, %v255_v34  ;;  %v265_v2 = vcombine.high %v232_v57, %v247_v58  ;;  %v345_v3 = vrot.slane %v331_v0, %v255_v34 }
  0xe5   :  { %379 = vrot.lane.b32.xlu0 %v346_v49, %s529_s24  ;;  %v280_v56 = vcombine.high %v256_v50, %v527_v42  ;;  %v281_v61 = vcombine.high %v263_v53, %v527_v42 }
  0xe6   :  { %v272_v1 = vrot.slane %v264_v62, %v255_v34  ;;  %v279_v4 = vrot.slane %v265_v2, %v255_v34  ;;  %v348_v5 = vcombine.high %v338_v63, %v527_v42  ;;  %v349_v7 = vcombine.high %v345_v3, %v527_v42 }
  0xe7   :  { %355 = vrot.lane.b32.xlu1 %v263_v53, %s528_s0 }
  0xe8   :  { %v282_v6 = vcombine.high %v272_v1, %v527_v42  ;;  %v283_v8 = vcombine.high %v279_v4, %v527_v42 }
  0xe9   :  { %351 = vrot.lane.b32.xlu0 %v280_v56, %s529_s24 }
  0xeb   :  { %387 = vrot.lane.b32.xlu1 %v347_v59, %s530_s25 }
  0xed   :  { %359 = vrot.lane.b32.xlu0 %v281_v61, %s530_s25 }
  0xef   :  { %391 = vrot.lane.b32.xlu1 %v338_v63, %s531_s26 }
  0xf1   :  { %363 = vrot.lane.b32.xlu0 %v272_v1, %s531_s26 }
  0xf3   :  { %399 = vrot.lane.b32.xlu1 %v345_v3, %s532_s27 }
  0xf5   :  { %371 = vrot.lane.b32.xlu0 %v279_v4, %s532_s27 }
  0xf7   :  { %395 = vrot.lane.b32.xlu1 %v348_v5, %s533_s28 }
  0xf9   :  { %367 = vrot.lane.b32.xlu0 %v282_v6, %s533_s28 }
  0xfb   :  { %403 = vrot.lane.b32.xlu1 %v349_v7, %s534_s29 }
  0xfd   :  { %375 = vrot.lane.b32.xlu0 %v283_v8, %s534_s29 }
 0x155   :  { %v384_v9 = vpop.permute.xlu1 %383 }
 0x157   :  { %v380_v10 = vpop.permute.xlu0 %379 }
 0x158   :  { %v420_v18 = vsel %vm406_vm3, %v322_v46, %v380_v10 }
 0x159   :  { %v356_v11 = vpop.permute.xlu1 %355  ;;  %v421_v21 = vsel %vm408_vm4, %v420_v18, %v384_v9 }
 0x15b   :  { %v352_v12 = vpop.permute.xlu0 %351 }
 0x15c   :  { %v407_v19 = vsel %vm406_vm3, %v256_v50, %v352_v12 }
 0x15d   :  { %v388_v13 = vpop.permute.xlu1 %387  ;;  %v409_v22 = vsel %vm408_vm4, %v407_v19, %v356_v11 }
 0x15e   :  { %v422_v24 = vsel %vm410_vm5, %v421_v21, %v388_v13 }
 0x15f   :  { %v360_v14 = vpop.permute.xlu0 %359 }
 0x160   :  { %v411_v25 = vsel %vm410_vm5, %v409_v22, %v360_v14 }
 0x161   :  { %v392_v15 = vpop.permute.xlu1 %391 }
 0x162   :  { %v423_v26 = vsel %vm412_vm6, %v422_v24, %v392_v15 }
 0x163   :  { %v364_v16 = vpop.permute.xlu0 %363 }
 0x164   :  { %v413_v27 = vsel %vm412_vm6, %v411_v25, %v364_v16 }
 0x165   :  { %v400_v17 = vpop.permute.xlu1 %399 }
 0x167   :  { %v372_v20 = vpop.permute.xlu0 %371 }
 0x169   :  { %v396_v23 = vpop.permute.xlu1 %395 }
 0x16a   :  { %v424_v29 = vsel %vm414_vm7, %v423_v26, %v396_v23 }
 0x16b   :  { %v368_v28 = vpop.permute.xlu0 %367  ;;  %v425_v32 = vsel %vm416_vm8, %v424_v29, %v400_v17 }
 0x16c   :  { %v415_v30 = vsel %vm414_vm7, %v413_v27, %v368_v28 }
 0x16d   :  { %v404_v31 = vpop.permute.xlu1 %403  ;;  %v417_v33 = vsel %vm416_vm8, %v415_v30, %v372_v20 }
 0x16e   :  { %v426_v35 = vsel %vm418_vm9, %v425_v32, %v404_v31 }
 0x16f   :  { %v376_v34 = vpop.permute.xlu0 %375 }
 0x170   :  { %v419_v36 = vsel %vm418_vm9, %v417_v33, %v376_v34 }
 0x171   :  { %v429_v37 = vcombine.low %v419_v36, %v426_v35 }
 0x173   :  { %461 = vst.sshfl [vmem:[#allocation2] sm:$0x33 pattern:$0x76325410] %v429_v37 }
 0x174   :  { %514 = shalt.err (!%p511_p4)
}
 0x175   :  { %448 = dma.vmem_to_hbm [thread:$0]  %s446_s3, 64, %s592_s2, [#allocation3]  }
 0x176   :  { %523 = dma.done.wait [#allocation3], 64  }
 0x177   :  { %524 = vsyncadd [#allocation3], 4294967232 }
 0x178   :  { %452 = vsyncpa [#allocation3], 1 }

</bundles_post_ra>
